<compile_context>
chip_gen: v5e
topology: v5e:2x2
jax: 0.10.0
libtpu: 0.0.40
codegen_flags: <defaults>
</compile_context>

<pallas_src>
import jax
import jax.numpy as jnp
from jax.experimental import pallas as pl
from jax.experimental.pallas import tpu as pltpu


def _round_up(x, m):
    return ((x + m - 1) // m) * m


def _pad2(a, rows, cols):
    pr, pc = rows - a.shape[0], cols - a.shape[1]
    if pr == 0 and pc == 0:
        return a
    return jnp.pad(a, ((0, pr), (0, pc)))


def _vmem_capacity_bytes():
    """Best-effort physical VMEM query (128 MiB on v5e/v6e, 64 MiB per TC on v7x)."""
    try:
        v = getattr(pltpu.get_tpu_info(), "vmem_capacity_bytes", None)
        if v:
            return int(v)
    except Exception:
        pass
    try:
        kind = jax.devices()[0].device_kind.lower()
        if "v7" in kind:
            return 64 << 20
    except Exception:
        pass
    return 128 << 20


# --------------------------------------------------------------------------------------
# Kernels
# --------------------------------------------------------------------------------------
def _fc_kernel_scratch(x_ref, w1_ref, b1_ref, w2_ref, b2_ref, o_ref, acc_ref):
    """General path: f32 accumulator scratch, cast to out dtype at the last k step."""
    k = pl.program_id(1)

    @pl.when(k == 0)
    def _():
        acc_ref[...] = jnp.zeros_like(acc_ref)

    # First matmul + bias + ReLU on this dff chunk (full in_dim contraction happens here,
    # so the elementwise-along-dff ReLU is exact per chunk).
    h = jnp.dot(x_ref[...], w1_ref[...], preferred_element_type=jnp.float32)
    h = jnp.maximum(h + b1_ref[...], 0.0)

    acc_ref[...] += jnp.dot(h.astype(w2_ref.dtype), w2_ref[...],
                            preferred_element_type=jnp.float32)

    @pl.when(k == pl.num_programs(1) - 1)
    def _():
        o_ref[...] = jnp.maximum(acc_ref[...] + b2_ref[...], 0.0).astype(o_ref.dtype)


def _fc_kernel_f32_out(x_ref, w1_ref, b1_ref, w2_ref, b2_ref, o_ref):
    """f32-output path: accumulate directly into the resident output block (no scratch)."""
    k = pl.program_id(1)

    @pl.when(k == 0)
    def _():
        o_ref[...] = jnp.zeros_like(o_ref)

    h = jnp.dot(x_ref[...], w1_ref[...], preferred_element_type=jnp.float32)
    h = jnp.maximum(h + b1_ref[...], 0.0)
    o_ref[...] += jnp.dot(h.astype(w2_ref.dtype), w2_ref[...],
                          preferred_element_type=jnp.float32)

    @pl.when(k == pl.num_programs(1) - 1)
    def _():
        o_ref[...] = jnp.maximum(o_ref[...] + b2_ref[...], 0.0)


# --------------------------------------------------------------------------------------
# Wrapper
# --------------------------------------------------------------------------------------
def prepare_fc_params(w1, b1, w2, b2, *, compute_dtype=jnp.bfloat16, tile_dff=None):
    """Pad + cast weights/biases ONCE (call at model init, not per forward).

    w1: (in_dim, dff)   already transposed for x @ W1 (PyTorch weight.T)
    b1: (dff,)
    w2: (dff, out_dim)  already transposed for h @ W2 (PyTorch weight.T)
    b2: (out_dim,)
    """
    in_dim, dff = w1.shape
    out_dim = w2.shape[1]

    large_vmem = _vmem_capacity_bytes() > (96 << 20)
    if tile_dff is None:
        tile_dff = 1024 if large_vmem else 512
    tile_dff = max(128, _round_up(tile_dff, 128))
    tile_dff = min(tile_dff, _round_up(dff, 128))

    # Lane-dense padding: every matmul last-dim to a multiple of 128; dff padded UP to a
    # multiple of tile_dff (no divisor hunt). Zero padding is exact: ReLU(0 + 0) = 0 and
    # the padded W2 rows / out cols are zero.
    in_dim_p = _round_up(in_dim, 128)
    out_dim_p = _round_up(out_dim, 128)
    dff_p = _round_up(dff, tile_dff)

    w1p = _pad2(jnp.asarray(w1, compute_dtype), in_dim_p, dff_p)
    w2p = _pad2(jnp.asarray(w2, compute_dtype), dff_p, out_dim_p)
    # Biases stay f32: they are added to f32 accumulators inside the kernel.
    b1p = _pad2(jnp.asarray(b1, jnp.float32).reshape(1, -1), 1, dff_p)
    b2p = _pad2(jnp.asarray(b2, jnp.float32).reshape(1, -1), 1, out_dim_p)

    return dict(w1=w1p, b1=b1p, w2=w2p, b2=b2p,
                in_dim=in_dim, dff=dff, out_dim=out_dim,
                tile_dff=tile_dff, compute_dtype=jnp.dtype(compute_dtype))


def fc_forward(x, params, *, tile_b=None, out_dtype=None):
    """Fused FC forward (eval-mode dropout == identity).  x: (B, in_dim)."""
    in_dim, dff, out_dim = params["in_dim"], params["dff"], params["out_dim"]
    w1p, b1p, w2p, b2p = params["w1"], params["b1"], params["w2"], params["b2"]
    compute_dtype = params["compute_dtype"]
    tile_dff = params["tile_dff"]

    B = x.shape[0]
    assert x.shape[1] == in_dim, (x.shape, in_dim)
    if out_dtype is None:
        out_dtype = x.dtype
    out_dtype = jnp.dtype(out_dtype)

    in_dim_p, dff_p = w1p.shape
    out_dim_p = w2p.shape[1]

    cdt_size = compute_dtype.itemsize
    out_size = out_dtype.itemsize
    row_align = 8 if cdt_size >= 4 else (16 if cdt_size == 2 else 32)

    vmem_cap = _vmem_capacity_bytes()
    large_vmem = vmem_cap > (96 << 20)
    hard_cap = (104 << 20) if large_vmem else (52 << 20)

    # Batch tile: aim for >= 2 tiles (so the "parallel" axis can shard across v7x's 2 TCs),
    # capped by a generation-aware size.
    if tile_b is None:
        cap = 1024 if large_vmem else (256 if in_dim_p >= 1024 else 512)
        two_tiles = _round_up(max(1, -(-B // 2)), row_align)
        tile_b = max(row_align, min(cap, two_tiles))
    tile_b = max(row_align, _round_up(tile_b, row_align))

    use_scratch = out_dtype != jnp.dtype(jnp.float32)

    # VMEM estimate with per-operand dtypes (x/W1/W2 in compute dtype; biases/acc f32;
    # output in out_dtype). Streamed blocks double-buffered; b2 single-buffered.
    def vmem_est(tb, td):
        return (2 * tb * in_dim_p * cdt_size          # x tile
                + 2 * in_dim_p * td * cdt_size        # W1 chunk
                + 2 * td * 4                          # b1 chunk (f32)
                + 2 * td * out_dim_p * cdt_size       # W2 chunk
                + out_dim_p * 4                       # b2 (f32, single-buffered)
                + 2 * tb * out_dim_p * out_size       # output tile
                + (tb * out_dim_p * 4 if use_scratch else 0))  # f32 accumulator

    # Shrink the footprint (never over-request the cap) if we'd overrun this generation's VMEM.
    budget = int(0.85 * hard_cap)
    while vmem_est(tile_b, tile_dff) > budget and tile_b > row_align:
        tile_b = max(row_align, _round_up(tile_b // 2, row_align))
    while vmem_est(tile_b, tile_dff) > budget and tile_dff % 256 == 0 and tile_dff > 128:
        tile_dff //= 2

    B_p = _round_up(B, tile_b)
    xp = _pad2(x.astype(compute_dtype), B_p, in_dim_p)

    grid = (B_p // tile_b, dff_p // tile_dff)

    est = vmem_est(tile_b, tile_dff)
    vmem_limit = int(min(max(int(1.3 * est) + (2 << 20), 32 << 20), hard_cap))

    in_specs = [
        pl.BlockSpec((tile_b, in_dim_p), lambda i, k: (i, 0)),      # x tile (resident over k)
        pl.BlockSpec((in_dim_p, tile_dff), lambda i, k: (0, k)),    # W1 chunk (streamed)
        pl.BlockSpec((1, tile_dff), lambda i, k: (0, k)),           # b1 chunk (f32)
        pl.BlockSpec((tile_dff, out_dim_p), lambda i, k: (k, 0)),   # W2 chunk (streamed)
        pl.BlockSpec((1, out_dim_p), lambda i, k: (0, 0),
                     pipeline_mode=pl.Buffered(1)),                 # b2: constant block
    ]
    out_spec = pl.BlockSpec((tile_b, out_dim_p), lambda i, k: (i, 0))

    kernel = _fc_kernel_scratch if use_scratch else _fc_kernel_f32_out
    scratch = ([pltpu.VMEM((tile_b, out_dim_p), jnp.float32)] if use_scratch else [])

    flops = 2 * B_p * dff_p * (in_dim_p + out_dim_p)
    bytes_accessed = int(xp.nbytes
                         + (B_p // tile_b) * (w1p.nbytes + w2p.nbytes + b1p.nbytes)
                         + b2p.nbytes + B_p * out_dim_p * out_size)

    out_p = pl.pallas_call(
        kernel,
        out_shape=jax.ShapeDtypeStruct((B_p, out_dim_p), out_dtype),
        grid_spec=pltpu.PrefetchScalarGridSpec(
            num_scalar_prefetch=0,
            grid=grid,
            in_specs=in_specs,
            out_specs=out_spec,
            scratch_shapes=scratch,
        ),
        compiler_params=pltpu.CompilerParams(
            dimension_semantics=("parallel", "arbitrary"),
            vmem_limit_bytes=vmem_limit),
        cost_estimate=pl.CostEstimate(flops=flops, transcendentals=0,
                                      bytes_accessed=bytes_accessed),
    )(xp, w1p, b1p, w2p, b2p)

    return out_p[:B, :out_dim]


def fc_apply(x, w1, b1, w2, b2, *, compute_dtype=jnp.bfloat16, tile_b=None, tile_dff=None):
    """Convenience: prepare + forward in one call (prod code should prepare once)."""
    params = prepare_fc_params(w1, b1, w2, b2, compute_dtype=compute_dtype, tile_dff=tile_dff)
    return fc_forward(x, params, tile_b=tile_b)


def fc_reference(x, w1, b1, w2, b2):
    h = jnp.maximum(x @ w1 + b1, 0.0)
    return jnp.maximum(h @ w2 + b2, 0.0)


def init_linear(key, fan_in, fan_out, dtype=jnp.float32):
    """PyTorch nn.Linear init U(-1/sqrt(fan_in), 1/sqrt(fan_in)); weight returned as (fan_in, fan_out)."""
    kw, kb = jax.random.split(key)
    bound = 1.0 / jnp.sqrt(jnp.asarray(fan_in, dtype))
    w = jax.random.uniform(kw, (fan_in, fan_out), dtype, minval=-bound, maxval=bound)
    b = jax.random.uniform(kb, (fan_out,), dtype, minval=-bound, maxval=bound)
    return w, b


if __name__ == "__main__":
    key = jax.random.PRNGKey(0)

    # ---- test 1: small ragged shapes, exact f32 MXU path (batch/lane padding + slicing) ----
    batch, in_dim, dff, out_dim = 10, 32, 64, 7
    kx, k1, k2, key = jax.random.split(key, 4)
    x = jax.random.normal(kx, (batch, in_dim), jnp.float32)
    w1, b1 = init_linear(k1, in_dim, dff)
    w2, b2 = init_linear(k2, dff, out_dim)
    ref = fc_reference(x, w1, b1, w2, b2)

    params_f32 = prepare_fc_params(w1, b1, w2, b2, compute_dtype=jnp.float32)
    out = jax.block_until_ready(fc_forward(x, params_f32))
    assert out.shape == (batch, out_dim)
    assert jnp.allclose(out, ref, atol=1e-4, rtol=1e-4)

    # ---- test 2: multi-step grid on BOTH axes (3 batch tiles x 3 dff tiles, f32-out accum) ----
    batch2, in_dim2, dff2, out_dim2 = 48, 40, 300, 7
    kx, k1, k2, key = jax.random.split(key, 4)
    x2 = jax.random.normal(kx, (batch2, in_dim2), jnp.float32)
    w1b, b1b = init_linear(k1, in_dim2, dff2)
    w2b, b2b = init_linear(k2, dff2, out_dim2)
    params2 = prepare_fc_params(w1b, b1b, w2b, b2b, compute_dtype=jnp.float32, tile_dff=128)
    out2 = jax.block_until_ready(fc_forward(x2, params2, tile_b=16))
    ref2 = fc_reference(x2, w1b, b1b, w2b, b2b)
    assert out2.shape == (batch2, out_dim2)
    assert jnp.allclose(out2, ref2, atol=1e-4, rtol=1e-4)

    # ---- test 3: default bf16 MXU operands, f32 accumulation and f32 output (no scratch) ----
    params_bf16 = prepare_fc_params(w1, b1, w2, b2)          # compute_dtype defaults to bf16
    out3 = jax.block_until_ready(fc_forward(x, params_bf16))
    assert out3.shape == (batch, out_dim)
    assert out3.dtype == jnp.float32
    assert jnp.allclose(out3, ref, atol=1e-1, rtol=1e-1)

    # ---- test 4: bf16 input / bf16 output -> scratch-accumulator kernel path ----
    out4 = jax.block_until_ready(fc_forward(x.astype(jnp.bfloat16), params_bf16))
    assert out4.shape == (batch, out_dim)
    assert out4.dtype == jnp.bfloat16
    assert jnp.allclose(out4.astype(jnp.float32), ref, atol=2e-1, rtol=2e-1)

    print("KERNEL_OK")
</pallas_src>

<mosaic_0001>
module attributes {stable_mosaic.version = 11 : i64} {
  func.func @_fc_kernel_f32_out(%arg0: i32, %arg1: i32, %arg2: memref<8x128xf32, #tpu.memory_space<vmem>>, %arg3: memref<128x128xf32, #tpu.memory_space<vmem>>, %arg4: memref<1x128xf32, #tpu.memory_space<vmem>>, %arg5: memref<128x128xf32, #tpu.memory_space<vmem>>, %arg6: memref<1x128xf32, #tpu.memory_space<vmem>>, %arg7: memref<8x128xf32, #tpu.memory_space<vmem>>) attributes {dimension_semantics = [#tpu.dimension_semantics<parallel>, #tpu.dimension_semantics<arbitrary>], iteration_bounds = array<i64: 2, 1>, scalar_prefetch = 0 : i64, scratch_operands = 0 : i64, tpu.core_type = #tpu.core_type<tc>, window_params = [{transform_indices = @transform_0, window_bounds = array<i64: 8, 128>}, {transform_indices = @transform_1, window_bounds = array<i64: 128, 128>}, {transform_indices = @transform_2, window_bounds = array<i64: 1, 128>}, {transform_indices = @transform_3, window_bounds = array<i64: 128, 128>}, {pipeline_mode = #tpu.pipeline_mode<synchronous>, transform_indices = @transform_4, window_bounds = array<i64: 1, 128>}, {transform_indices = @transform_5, window_bounds = array<i64: 8, 128>}]} {
    %c0_i32 = arith.constant 0 : i32
    %0 = arith.cmpi eq, %arg1, %c0_i32 : i32
    %1 = arith.extui %0 : i1 to i32
    %c0_i32_0 = arith.constant 0 : i32
    %2 = arith.cmpi ne, %1, %c0_i32_0 : i32
    scf.if %2 {
      %cst_16 = arith.constant 0.000000e+00 : f32
      %19 = vector.broadcast %cst_16 : f32 to vector<8x128xf32>
      %c0_17 = arith.constant 0 : index
      %c0_18 = arith.constant 0 : index
      %20 = vector.load %arg7[%c0_17, %c0_18] : memref<8x128xf32, #tpu.memory_space<vmem>>, vector<8x128xf32>
      tpu.vector_store %arg7[%c0_17, %c0_18], %19 {strides = array<i32>} : memref<8x128xf32, #tpu.memory_space<vmem>>, vector<8x128xf32>,
    } else {
    }
    %c0 = arith.constant 0 : index
    %c0_1 = arith.constant 0 : index
    %3 = vector.load %arg2[%c0, %c0_1] : memref<8x128xf32, #tpu.memory_space<vmem>>, vector<8x128xf32>
    %c0_2 = arith.constant 0 : index
    %c0_3 = arith.constant 0 : index
    %4 = vector.load %arg3[%c0_2, %c0_3] : memref<128x128xf32, #tpu.memory_space<vmem>>, vector<128x128xf32>
    %cst = arith.constant dense<0.000000e+00> : vector<8x128xf32>
    %5 = tpu.matmul %3, %4, %cst {dimension_numbers = #tpu.dot_dimension_numbers<[1], [0], [0], [1], [0, 0, 1, 1], [], []>} : vector<8x128xf32>, vector<128x128xf32>, vector<8x128xf32> -> vector<8x128xf32>
    %c0_4 = arith.constant 0 : index
    %c0_5 = arith.constant 0 : index
    %6 = vector.load %arg4[%c0_4, %c0_5] : memref<1x128xf32, #tpu.memory_space<vmem>>, vector<1x128xf32>
    %7 = vector.broadcast %6 : vector<1x128xf32> to vector<8x128xf32>
    %8 = arith.addf %5, %7 : vector<8x128xf32>
    %cst_6 = arith.constant 0.000000e+00 : f32
    %9 = vector.broadcast %cst_6 : f32 to vector<8x128xf32>
    %10 = arith.maximumf %8, %9 : vector<8x128xf32>
    %c0_7 = arith.constant 0 : index
    %c0_8 = arith.constant 0 : index
    %11 = vector.load %arg7[%c0_7, %c0_8] : memref<8x128xf32, #tpu.memory_space<vmem>>, vector<8x128xf32>
    %c0_9 = arith.constant 0 : index
    %c0_10 = arith.constant 0 : index
    %12 = vector.load %arg5[%c0_9, %c0_10] : memref<128x128xf32, #tpu.memory_space<vmem>>, vector<128x128xf32>
    %cst_11 = arith.constant dense<0.000000e+00> : vector<8x128xf32>
    %13 = tpu.matmul %10, %12, %cst_11 {dimension_numbers = #tpu.dot_dimension_numbers<[1], [0], [0], [1], [0, 0, 1, 1], [], []>} : vector<8x128xf32>, vector<128x128xf32>, vector<8x128xf32> -> vector<8x128xf32>
    %14 = arith.addf %11, %13 : vector<8x128xf32>
    %c0_12 = arith.constant 0 : index
    %c0_13 = arith.constant 0 : index
    %15 = vector.load %arg7[%c0_12, %c0_13] : memref<8x128xf32, #tpu.memory_space<vmem>>, vector<8x128xf32>
    tpu.vector_store %arg7[%c0_12, %c0_13], %14 {strides = array<i32>} : memref<8x128xf32, #tpu.memory_space<vmem>>, vector<8x128xf32>,
    %c0_i32_14 = arith.constant 0 : i32
    %16 = arith.cmpi eq, %arg1, %c0_i32_14 : i32
    %17 = arith.extui %16 : i1 to i32
    %c0_i32_15 = arith.constant 0 : i32
    %18 = arith.cmpi ne, %17, %c0_i32_15 : i32
    scf.if %18 {
      %c0_16 = arith.constant 0 : index
      %c0_17 = arith.constant 0 : index
      %19 = vector.load %arg7[%c0_16, %c0_17] : memref<8x128xf32, #tpu.memory_space<vmem>>, vector<8x128xf32>
      %c0_18 = arith.constant 0 : index
      %c0_19 = arith.constant 0 : index
      %20 = vector.load %arg6[%c0_18, %c0_19] : memref<1x128xf32, #tpu.memory_space<vmem>>, vector<1x128xf32>
      %21 = vector.broadcast %20 : vector<1x128xf32> to vector<8x128xf32>
      %22 = arith.addf %19, %21 : vector<8x128xf32>
      %cst_20 = arith.constant 0.000000e+00 : f32
      %23 = vector.broadcast %cst_20 : f32 to vector<8x128xf32>
      %24 = arith.maximumf %22, %23 : vector<8x128xf32>
      %c0_21 = arith.constant 0 : index
      %c0_22 = arith.constant 0 : index
      %25 = vector.load %arg7[%c0_21, %c0_22] : memref<8x128xf32, #tpu.memory_space<vmem>>, vector<8x128xf32>
      tpu.vector_store %arg7[%c0_21, %c0_22], %24 {strides = array<i32>} : memref<8x128xf32, #tpu.memory_space<vmem>>, vector<8x128xf32>,
    } else {
    }
    return
  }
  func.func @transform_0(%arg0: i32, %arg1: i32) -> (i32, i32) {
    %c0_i32 = arith.constant 0 : i32
    %c0_i32_0 = arith.constant 0 : i32
    return %arg0, %c0_i32 : i32, i32
  }
  func.func @transform_1(%arg0: i32, %arg1: i32) -> (i32, i32) {
    %c0_i32 = arith.constant 0 : i32
    %c0_i32_0 = arith.constant 0 : i32
    return %c0_i32, %arg1 : i32, i32
  }
  func.func @transform_2(%arg0: i32, %arg1: i32) -> (i32, i32) {
    %c0_i32 = arith.constant 0 : i32
    %c0_i32_0 = arith.constant 0 : i32
    return %c0_i32, %arg1 : i32, i32
  }
  func.func @transform_3(%arg0: i32, %arg1: i32) -> (i32, i32) {
    %c0_i32 = arith.constant 0 : i32
    %c0_i32_0 = arith.constant 0 : i32
    return %arg1, %c0_i32 : i32, i32
  }
  func.func @transform_4(%arg0: i32, %arg1: i32) -> (i32, i32) {
    %c0_i32 = arith.constant 0 : i32
    %c0_i32_0 = arith.constant 0 : i32
    %c0_i32_1 = arith.constant 0 : i32
    return %c0_i32, %c0_i32_0 : i32, i32
  }
  func.func @transform_5(%arg0: i32, %arg1: i32) -> (i32, i32) {
    %c0_i32 = arith.constant 0 : i32
    %c0_i32_0 = arith.constant 0 : i32
    return %arg0, %c0_i32 : i32, i32
  }
}

</mosaic_0001>

<bundles_post_ra>
// kernel: tpu_custom_call.1
= control target key start
LH: loop header
LB: loop body
LE: loop exit
PB: predicated region body
PF: predicated region fallthrough
CT: control target
= control target key end

     0   :  { %10 = vsyncpa [#allocation3], 0  ;;  %s1018_s0 = inlined_call_operand.hbm [shape: f32[16,128], index: 0, kind: input, shape index: {}]   ;;  %s1019_s1 = inlined_call_operand.hbm [shape: f32[128,128], index: 1, kind: input, shape index: {}]   ;;  %s1020_s2 = inlined_call_operand.vmem [shape: f32[1,128], index: 2, kind: input, shape index: {}]   ;;  %s1021_s3 = inlined_call_operand.hbm [shape: f32[128,128], index: 3, kind: input, shape index: {}]   ;;  %s1022_s4 = inlined_call_operand.vmem [shape: f32[1,128], index: 4, kind: input, shape index: {}]   ;;  %s1023_s5 = inlined_call_operand.hbm [shape: f32[16,128], index: 5, kind: output, shape index: {}]  }
   0x1   :  { %12 = vsyncpa [#allocation3 + $0x1], 0 }
   0x2   :  { %13 = vsyncpa [#allocation6], 0 }
   0x3   :  { %14 = vsyncpa [#allocation4], 0 }
   0x4   :  { %16 = vsyncpa [#allocation4 + $0x1], 0  ;;  %s861_s18 = smov 0   ;;  %s863_s19 = smov 0  }
   0x5   :  { %s865_s20 = smov 0   ;;  %s867_s21 = smov 0  }
   0x6   :  { %s869_s22 = smov 0   ;;  %s871_s23 = smov 0  }
   0x7 LB: > { %s543_s24 = sadd.s32 4294967295, %s825_s23   ;;  %p545_p0 = scmp.ge.s32.totalorder %s825_s23, 1  ;;  %s825_s23 = sphi %s871_s23, %s22_s23   ;;  %s821_s22 = sphi %s869_s22, %s1033_s22   ;;  %s817_s21 = sphi %s867_s21, %s1032_s21   ;;  %s813_s20 = sphi %s865_s20, %s1031_s20   ;;  %s809_s19 = sphi %s863_s19, %s1030_s19   ;;  %s805_s18 = sphi %s861_s18, %s1029_s18  }
   0x8   : > { %p895_p1 = scmp.eq.s32.totalorder %s543_s24, 0  ;;  %p190_p2 = scmp.lt.s32.totalorder %s825_s23, 3 }
   0x9   : > { %s203_s28 = sshll.u32 %s1019_s1, 4  ;;  %s827_s30 = smov [#allocation5]   ;;  %s204_s28 = int_to_ptr.hbm [resolvable:$true] %s203_s28 }
   0xa   : > { %p903_p3 = pnand %p545_p0, %p190_p2  ;;  %s205_s6 = sshll.u32 %s827_s30, 4  ;;  %s206_s6 = int_to_ptr.vmem [resolvable:$true] %s205_s6 }
   0xb   : > { %p549_p6 = scmp.ge.s32.totalorder %s825_s23, 2  ;;  %s226_s9 = sshll.u32 %s1021_s3, 4  ;;  %s227_s9 = int_to_ptr.hbm [resolvable:$true] %s226_s9 }
   0xc   : > { %p573_p4 = pneg %p903_p3  ;;  %s828_s10 = smov 128  }
   0xd   : > { %s829_s11 = smov 8   ;;  %s830_s12 = smov [#allocation7]  }
   0xe   : > { %p574_p5 = pnand %p573_p4, %p895_p1  ;;  %s228_s13 = sshll.u32 %s830_s12, 4  ;;  %s229_s13 = int_to_ptr.vmem [resolvable:$true] %s228_s13 }
   0xf   : > { %s34_s14 = sadd.s32 1, %s821_s22  ;;  %s544_s15 = sadd.s32 4294967294, %s825_s23  }
  0x10   : > { %576 = dma.hbm_to_vmem [thread:$0]  (!%p574_p5), %s204_s28, 2048, %s206_s6, [#allocation6], %s828_s10, %s828_s10, %s829_s11  }
  0x11   : > { %579 = dma.hbm_to_vmem [thread:$0]  (!%p574_p5), %s227_s9, 2048, %s229_s13, [#allocation6], %s828_s10, %s828_s10, %s829_s11  }
  0x12   : > { %p36_p7 = scmp.ge.s32.totalorder %s34_s14, 2  ;;  %s41_s16 = sadd.s32 1, %s813_s20 }
  0x13   : > { %p48_p8 = scmp.ne.s32.totalorder %s813_s20, %s809_s19  ;;  %p49_p9 = scmp.eq.s32.totalorder %s825_s23, 0 }
  0x14   : > { %s1035_s14 = smov (%p36_p7, %s34_s14), 0  ;;  %p54_p10 = scmp.ne.s32.totalorder %s809_s19, %s805_s18 }
  0x15   : > { %s38_s17 = ssub.s32 %s821_s22, %s1035_s14  ;;  %p177_p11 = scmp.eq.s32.totalorder %s543_s24, 1 }
  0x16   : > { %p39_p12 = scmp.eq.s32.totalorder %s38_s17, 0  ;;  %p931_p13 = por %p895_p1, %p54_p10 }
  0x17   : > { %p935_p0 = por %p177_p11, %p48_p8  ;;  %p183_p2 = scmp.eq.s32.totalorder %s544_s15, 1 }
  0x18   : > { %s940_s28 = scalar_select %p39_p12, %s813_s20, %s41_s16  }
  0x19   : > { %p50_p4 = por %p49_p9, %p48_p8  ;;  %p942_p5 = por %p183_p2, %p54_p10 }
  0x1a   : > { %s245_s6 = sand.u32 1, %s813_s20   ;;  %s551_s24 = sshll.u32 %s821_s22, 3 }
  0x1b   : > { %p590_p7 = scmp.lt.s32.totalorder %s825_s23, 2  ;;  %s550_s7 = sshll.u32 %s245_s6, 3 }
  0x1c   : > { %s253_s10 = scalar_lea.hbm %s1018_s0, %s551_s24  ;;  %s249_s12 = scalar_lea.vmem [#allocation2], %s550_s7 }
  0x1d   : > { %s255_s11 = sshll.u32 %s253_s10, 4  ;;  %s257_s13 = sshll.u32 %s249_s12, 4  ;;  %s256_s11 = int_to_ptr.hbm [resolvable:$true] %s255_s11  ;;  %s258_s13 = int_to_ptr.vmem [resolvable:$true] %s257_s13 }
  0x1e   : > { %p581_p11 = pnand %p590_p7, %p50_p4  ;;  %s246_s15 = scalar_lea.sflag [#allocation3], %s245_s6 }
  0x1f   : > { %266 = sbr.rel (%p903_p3) target bundleno = 334 (0x14e), region = 40  ;;  %s955_s16 = sand.u32 (!%p903_p3), 1, %s809_s19  }
  0x20   : > { %583 = dma.hbm_to_vmem [thread:$0]  (!%p581_p11), %s256_s11, 128, %s258_s13, %s246_s15  }
  0x21   : > { %s553_s17 = sshll.u32 (!%p903_p3), %s955_s16, 3  ;;  %s269_s24 = scalar_lea.sflag (!%p903_p3), [#allocation3], %s955_s16 }
  0x22   : > { %s961_s7 = scalar_lea.vmem (!%p903_p3), [#allocation2], %s553_s17 }
  0x24   : > { %792 = dma.done.wait (%p931_p13), %s269_s24, 128  }
  0x25   : > { %794 = vsyncadd (%p931_p13), %s269_s24, 4294967168 }
  0x26   : > { %796 = dma.done.wait (%p895_p1), [#allocation6], 4096  }
  0x27   : > { %798 = vsyncadd (%p895_p1), [#allocation6], 4294963200  ;;  %v338_v0 = vld [vmem:[#allocation5 + $0x78] sm:$0xff]  ;;  %v337_v1 = vld [vmem:[#allocation5 + $0x70] sm:$0xff]  ;;  %s558_s26 = sshll.u32 %s817_s21, 3  ;;  %s312_s12 = scalar_lea.vmem [#allocation8], %s553_s17 }
  0x28   : > { %343 = vmatpush.msra.mxu0 %v338_v0  ;;  %v336_v2 = vld [vmem:[#allocation5 + $0x68] sm:$0xff]  ;;  %v335_v3 = vld [vmem:[#allocation5 + $0x60] sm:$0xff]  ;;  %v380_v4 = vld [vmem:[#allocation7 + $0x78] sm:$0xff]  ;;  %s425_s11 = scalar_lea.hbm %s1023_s5, %s558_s26  ;;  %s427_s13 = sshll.u32 %s312_s12, 4  ;;  %s428_s13 = int_to_ptr.vmem [resolvable:$true] %s427_s13 }
  0x29   : > { %v334_v5 = vld [vmem:[#allocation5 + $0x58] sm:$0xff]  ;;  %381 = vmatpush.msra.mxu1 %v380_v4  ;;  %v379_v6 = vld [vmem:[#allocation7 + $0x70] sm:$0xff]  ;;  %v378_v7 = vld [vmem:[#allocation7 + $0x68] sm:$0xff]  ;;  %s429_s15 = sshll.u32 %s425_s11, 4  ;;  %s415_s21 = scalar_lea.sflag [#allocation4], %s955_s16  ;;  %s430_s15 = int_to_ptr.hbm [resolvable:$true] %s429_s15 }
  0x2a   : > { %344 = vmatpush.msra.mxu0 %v337_v1  ;;  %v333_v8 = vld [vmem:[#allocation5 + $0x50] sm:$0xff]  ;;  %v377_v9 = vld [vmem:[#allocation7 + $0x60] sm:$0xff]  ;;  %v332_v10 = vld [vmem:[#allocation5 + $0x48] sm:$0xff]  ;;  %s753_s24 = sshra.s32 %s430_s15, 4  ;;  %s759_s26 = scalar_lea.hbm %s1023_s5, 16  ;;  %s754_s24 = int_to_ptr.hbm [resolvable:$true] %s753_s24 }
  0x2b   : > { %382 = vmatpush.msra.mxu1 %v379_v6  ;;  %v376_v11 = vld [vmem:[#allocation7 + $0x58] sm:$0xff]  ;;  %v331_v12 = vld [vmem:[#allocation5 + $0x40] sm:$0xff]  ;;  %v375_v13 = vld [vmem:[#allocation7 + $0x50] sm:$0xff]  ;;  %p760_p9 = scmp.lt.s32.totalorder %s754_s24, %s1023_s5 }
  0x2c   : > { %345 = vmatpush.msra.mxu0 %v336_v2  ;;  %v330_v14 = vld [vmem:[#allocation5 + $0x38] sm:$0xff]  ;;  %v374_v15 = vld [vmem:[#allocation7 + $0x48] sm:$0xff]  ;;  %v329_v16 = vld [vmem:[#allocation5 + $0x30] sm:$0xff] }
  0x2d   : > { %383 = vmatpush.msra.mxu1 %v378_v7  ;;  %v373_v17 = vld [vmem:[#allocation7 + $0x40] sm:$0xff]  ;;  %v328_v18 = vld [vmem:[#allocation5 + $0x28] sm:$0xff]  ;;  %v372_v19 = vld [vmem:[#allocation7 + $0x38] sm:$0xff] }
  0x2e   : > { %346 = vmatpush.msra.mxu0 %v335_v3  ;;  %v327_v20 = vld [vmem:[#allocation5 + $0x20] sm:$0xff]  ;;  %v371_v21 = vld [vmem:[#allocation7 + $0x30] sm:$0xff]  ;;  %v326_v22 = vld [vmem:[#allocation5 + $0x18] sm:$0xff] }
  0x2f   : > { %384 = vmatpush.msra.mxu1 %v377_v9  ;;  %v370_v23 = vld [vmem:[#allocation7 + $0x28] sm:$0xff]  ;;  %v325_v24 = vld [vmem:[#allocation5 + $0x10] sm:$0xff]  ;;  %v369_v25 = vld [vmem:[#allocation7 + $0x20] sm:$0xff] }
  0x30   : > { %347 = vmatpush.msra.mxu0 %v334_v5  ;;  %v324_v26 = vld [vmem:[#allocation5 + $0x8] sm:$0xff]  ;;  %v368_v27 = vld [vmem:[#allocation7 + $0x18] sm:$0xff]  ;;  %v323_v28 = vld [vmem:[#allocation5] sm:$0xff] }
  0x31   : > { %385 = vmatpush.msra.mxu1 %v376_v11  ;;  %v322_v29 = vld [vmem:[%s961_s7] sm:$0xff]  ;;  %v366_v31 = vld [vmem:[#allocation7 + $0x8] sm:$0xff]  ;;  %v365_v32 = vld [vmem:[#allocation7] sm:$0xff]  ;;  %s755_s7 = scalar_lea.hbm %s754_s24, 8 }
  0x32   : > { %348 = vmatpush.msra.mxu0 %v333_v8  ;;  %v367_v30 = vld [vmem:[#allocation7 + $0x10] sm:$0xff]  ;;  %p756_p1 = scmp.ne.s32.totalorder %s754_s24, %s755_s7  ;;  %p761_p10 = scmp.lt.s32.totalorder %s759_s26, %s755_s7 }
  0x33   : > { %386 = vmatpush.msra.mxu1 %v375_v13  ;;  %v647_v33 = vld [vmem:[%s1020_s2] ss:$0 sm:$0xff] }
  0x34   : > { %349 = vmatpush.msra.mxu0 %v332_v10  ;;  %v648_v37 = vld [vmem:[%s1022_s4] ss:$0 sm:$0xff]  ;;  %p757_p3 = pnand %p756_p1, %p935_p0  ;;  %p762_p12 = por %p761_p10, %p760_p9 }
  0x35   : > { %387 = vmatpush.msra.mxu1 %v374_v15 }
  0x36   : > { %350 = vmatpush.msra.mxu0 %v331_v12  ;;  %p758_p8 = pneg %p757_p3 }
  0x37   : > { %388 = vmatpush.msra.mxu1 %v373_v17 }
  0x38   : > { %351 = vmatpush.msra.mxu0 %v330_v14  ;;  %p763_p13 = pnand %p762_p12, %p758_p8 }
  0x39   : > { %389 = vmatpush.msra.mxu1 %v372_v19 }
  0x3a   : > { %352 = vmatpush.msra.mxu0 %v329_v16 }
  0x3b   : > { %390 = vmatpush.msra.mxu1 %v371_v21 }
  0x3c   : > { %353 = vmatpush.msra.mxu0 %v328_v18 }
  0x3d   : > { %391 = vmatpush.msra.mxu1 %v370_v23 }
  0x3e   : > { %354 = vmatpush.msra.mxu0 %v327_v20 }
  0x3f   : > { %392 = vmatpush.msra.mxu1 %v369_v25 }
  0x40   : > { %355 = vmatpush.msra.mxu0 %v326_v22 }
  0x41   : > { %393 = vmatpush.msra.mxu1 %v368_v27 }
  0x42   : > { %356 = vmatpush.msra.mxu0 %v325_v24 }
  0x43   : > { %394 = vmatpush.msra.mxu1 %v367_v30 }
  0x44   : > { %357 = vmatpush.msra.mxu0 %v324_v26 }
  0x45   : > { %395 = vmatpush.msra.mxu1 %v366_v31 }
  0x46   : > { %358 = vmatpush.msra.mxu0 %v323_v28 }
  0x47   : > { %359 = vmatmul.f32.vlgmr.msra.gmra.mxu0 %v322_v29  ;;  %396 = vmatpush.msra.mxu1 %v365_v32 }
  0xc4   : > { %v360_v34 = vpop.f32.mrf.mxu0 }
  0xc5   : > { %v361_v35 = vadd.f32 %v647_v33, %v360_v34 }
  0xc7   : > { %v363_v36 = vmax.f32 %v361_v35, 0.0 }
  0xc9   : > { %397 = vmatmul.f32.vlgmr.msra.gmra.mxu1 %v363_v36 }
 0x146   : > { %v398_v38 = vpop.f32.mrf.mxu1 }
 0x147   : > { %v411_v39 = vadd.f32 %v648_v37, %v398_v38 }
 0x149   : > { %v412_v40 = vmax.f32 %v411_v39, 0.0 }
 0x14b   : > { %413 = vst [vmem:[%s312_s12] sm:$0xff] %v412_v40 }
 0x14c   : > { %766 = shalt.err (!%p763_p13)
}
 0x14d   : > { %571 = dma.vmem_to_hbm [thread:$0]  (%p935_p0), %s428_s13, 128, %s430_s15, %s415_s21  }
 0x14e PF: > { %s441_s16 = sand.u32 1, %s805_s18   ;;  %p585_p2 = pnand %p549_p6, %p942_p5 }
 0x14f   : > { %s442_s8 = scalar_lea.sflag [#allocation4], %s441_s16 }
 0x150   : > { %p586_p4 = pneg %p585_p2 }
 0x152   : > { %800 = dma.done.wait (%p586_p4), %s442_s8, 128  }
 0x153   : > { %802 = vsyncadd (%p586_p4), %s442_s8, 4294967168  ;;  %s22_s23 = sadd.s32 1, %s825_s23   ;;  %s1029_s18 = smov %s809_s19 }
 0x154   : > { %p19_p7 = scmp.ge.s32.totalorder %s22_s23, 4   ;;  %s1030_s19 = smov %s813_s20 }
 0x155   : > { %s1031_s20 = smov %s940_s28  ;;  %s1032_s21 = smov %s821_s22 }
 0x156   : > { %s1033_s22 = smov %s1035_s14  ;;  %21 = sbr.rel (!%p19_p7) target bundleno = 7 (0x7), region = 106 }
 0x15b   :  { %448 = vsyncpa [#allocation3], 1 }
 0x15c   :  { %450 = vsyncpa [#allocation3 + $0x1], 1 }
 0x15d   :  { %451 = vsyncpa [#allocation6], 1 }
 0x15e   :  { %452 = vsyncpa [#allocation4], 1 }
 0x15f   :  { %454 = vsyncpa [#allocation4 + $0x1], 1 }

</bundles_post_ra>
